<compile_context>
chip_gen: v6e
topology: v6e:2x2x1
jax: 0.10.0
libtpu: 0.0.40
codegen_flags: <defaults>
</compile_context>

<pallas_src>
import functools
import numpy as np

import jax
import jax.numpy as jnp
from jax import lax
from jax.experimental import pallas as pl
from jax.experimental.pallas import tpu as pltpu

BN_EPS = 1e-5


# --------------------------------------------------------------------------
# Fused kernel: conv_x (3x3+BN+ReLU) + bilinear resize + pools + conv_xy
#               + ChannelAtt + blend.  Big tensors are (batch_block*C, H*W):
#               channels (and folded batch) on sublanes, spatial on lanes.
# --------------------------------------------------------------------------
def _msa_fused_kernel(x_ref, y_ref, wc_ref, rt_ref, bnv_ref, w1t_ref, w2_ref,
                      o_ref, *, W):
    # x_ref : (1, nb*Cin, HWx) bf16       y_ref : (1, nb*C, HWy) bf16
    # wc_ref: (9, nb*C, nb*Cin) bf16      rt_ref: (HWy, HWx) bf16
    # bnv_ref: (nb*C, 5) f32  [bnx_s, bnx_b, bn2_b, bn3_s*wbn, bn3_b*wbn]
    # w1t_ref: (4*nb*C + 1, nb*C2) f32 (bn1 scale folded, last row = bn1 bias)
    # w2_ref : (nb*C, nb*C2) f32 (bn2 scale folded)
    # o_ref  : (1, nb*C, HWx) f32
    R = x_ref.shape[1]            # nb * Cin
    HW = x_ref.shape[2]           # H*W of ONE image (batch lives on the sublane axis)
    xf = x_ref[0]                                                    # (R, HW) bf16

    # Pixel-column index built in-kernel; boundary masks hoisted out of the unrolled
    # 3x3 tap loop (JAX does not CSE the broadcasts).
    col = lax.broadcasted_iota(jnp.int32, (1, HW), 1) % W
    mask_l = col >= 1               # pixel has a left neighbour
    mask_r = col <= W - 2           # pixel has a right neighbour

    def shifted(d):
        # t[:, p] = xf[:, p + d], zero fill outside [0, HW).  The zero fill is exactly
        # the vertical (top/bottom row) conv padding, since each sublane row holds one
        # image's flattened H*W pixels.
        if d > 0:
            return jnp.concatenate([xf[:, d:], jnp.zeros((R, d), xf.dtype)], axis=1)
        if d < 0:
            return jnp.concatenate([jnp.zeros((R, -d), xf.dtype), xf[:, :HW + d]], axis=1)
        return xf

    # ---- prepare_x: 3x3 conv (pad=1, no bias) as 9 accumulating split-K matmuls.
    #      (no sublane-misaligned (9*Cin, HW) concat; bf16 taps, f32 MXU accumulation)
    acc = None
    for kh in range(3):
        for kw in range(3):
            t = shifted((kh - 1) * W + (kw - 1))
            if kw == 0:                                   # no left neighbour in col 0
                t = jnp.where(mask_l, t, 0)
            elif kw == 2:                                 # no right neighbour in last col
                t = jnp.where(mask_r, t, 0)
            p = jnp.dot(wc_ref[kh * 3 + kw], t, preferred_element_type=jnp.float32)
            acc = p if acc is None else acc + p

    bnv = bnv_ref[...]                                               # (nb*C, 5) f32
    x_feat = jnp.maximum(acc * bnv[:, 0:1] + bnv[:, 1:2], 0.0)       # BN (folded) + ReLU

    # ---- prepare_y: bilinear align_corners=True resize as one matmul with kron(Lh, Lw)^T.
    y_up = jnp.dot(y_ref[0], rt_ref[...], preferred_element_type=jnp.float32)   # (nb*C, HW)

    # ---- xy_avg_max -> (4*nb*C + 1, 1) column [avg_x, avg_y, max_x, max_y, 1]
    #      (the trailing 1 picks up the folded bn1 bias row of w1t).
    attc = jnp.concatenate(
        [jnp.mean(x_feat, axis=1, keepdims=True),
         jnp.mean(y_up, axis=1, keepdims=True),
         jnp.max(x_feat, axis=1, keepdims=True),
         jnp.max(y_up, axis=1, keepdims=True),
         jnp.ones((1, 1), jnp.float32)], axis=0)

    # ---- conv_xy: 1x1 -> BN -> ReLU -> 1x1 -> BN on the VPU/XLU (M=1 matmuls would
    #      waste the MXU); BN scales/biases are pre-folded into w1t / w2 / bnv.
    h = jnp.maximum(jnp.sum(w1t_ref[...] * attc, axis=0, keepdims=True), 0.0)   # (1, nb*C2)
    a = jnp.sum(w2_ref[...] * h, axis=1, keepdims=True) + bnv[:, 2:3]           # (nb*C, 1)

    # ---- ChannelAtt: att = sigmoid(bn3(a) * |gamma|/sum|gamma|) * a
    att = jax.nn.sigmoid(a * bnv[:, 3:4] + bnv[:, 4:5]) * a

    # ---- fuse: out = x*att + y*(1-att) = y + att*(x - y); lane-dense (nb*C, HW) store.
    o_ref[0] = y_up + att * (x_feat - y_up)


# --------------------------------------------------------------------------
# Glue: resize matrices, params, batch-folding helpers, wrapper, reference
# --------------------------------------------------------------------------
def resize_matrix(out_size, in_size):
    """Interpolation matrix matching F.interpolate(mode='bilinear', align_corners=True)."""
    L = np.zeros((out_size, in_size), np.float32)
    if out_size == 1 or in_size == 1:
        L[:, 0] = 1.0
        return L
    src = np.arange(out_size, dtype=np.float64) * (in_size - 1) / (out_size - 1)
    i0 = np.clip(np.floor(src).astype(np.int64), 0, in_size - 1)
    i1 = np.minimum(i0 + 1, in_size - 1)
    w = (src - i0).astype(np.float32)
    np.add.at(L, (np.arange(out_size), i0), 1.0 - w)
    np.add.at(L, (np.arange(out_size), i1), w)
    return L


def build_resize_kron(Hx, Wx, Hy, Wy):
    """(Hy*Wy, Hx*Wx) matrix RT such that y_up_flat = y_flat @ RT."""
    lh = resize_matrix(Hx, Hy)
    lw = resize_matrix(Wx, Wy)
    return np.kron(lh, lw).T.astype(np.float32)


def _bn_fold(key, c):
    k1, k2, k3, k4 = jax.random.split(key, 4)
    gamma = 1.0 + 0.1 * jax.random.normal(k1, (c,), jnp.float32)
    beta = 0.1 * jax.random.normal(k2, (c,), jnp.float32)
    mean = 0.1 * jax.random.normal(k3, (c,), jnp.float32)
    var = 0.5 + jax.random.uniform(k4, (c,), jnp.float32)
    scale = gamma / jnp.sqrt(var + BN_EPS)
    bias = beta - mean * scale
    return gamma, scale, bias


def init_params(key, x_ch, y_ch):
    c2 = y_ch // 2
    ks = jax.random.split(key, 8)
    conv_x_w = 0.2 * jax.random.normal(ks[0], (y_ch, x_ch, 3, 3), jnp.float32)  # OIHW
    _, bnx_s, bnx_b = _bn_fold(ks[1], y_ch)
    w1 = 0.3 * jax.random.normal(ks[2], (c2, 4 * y_ch), jnp.float32)            # OI (1x1)
    _, bn1_s, bn1_b = _bn_fold(ks[3], c2)
    w2 = 0.3 * jax.random.normal(ks[4], (y_ch, c2), jnp.float32)                # OI (1x1)
    _, bn2_s, bn2_b = _bn_fold(ks[5], y_ch)
    gamma3, bn3_s, bn3_b = _bn_fold(ks[6], y_ch)
    weight_bn = jnp.abs(gamma3) / jnp.sum(jnp.abs(gamma3))
    return dict(conv_x_w=conv_x_w, bnx_s=bnx_s, bnx_b=bnx_b,
                w1=w1, bn1_s=bn1_s, bn1_b=bn1_b,
                w2=w2, bn2_s=bn2_s, bn2_b=bn2_b,
                bn3_s=bn3_s, bn3_b=bn3_b, weight_bn=weight_bn)


def _block_diag(w, n):
    """kron(I_n, w): (M, N) -> (n*M, n*N).  Batch-folding helper for the weights."""
    if n == 1:
        return w
    eye = jnp.eye(n, dtype=w.dtype)
    m, k = w.shape
    return jnp.einsum("bd,mn->bmdn", eye, w).reshape(n * m, n * k)


def multi_scale_attention(params, x_nchw, y_nchw, batch_block=None):
    """Forward of MultiScaleAttention. Inputs/outputs are NCHW (PyTorch convention)."""
    B, x_ch, Hx, Wx = x_nchw.shape
    _, y_ch, Hy, Wy = y_nchw.shape
    HWx, HWy = Hx * Wx, Hy * Wy
    c2 = params["w1"].shape[0]

    if batch_block is None:
        # Fold batch into the matmul M dim, but keep >= 2 grid steps when B >= 2 so both
        # v7x TensorCores get work; the extra step costs ~0.35us on single-TC v5e/v6e.
        batch_block = 1
        for d in range(B // 2, 0, -1):
            if B % d == 0:
                batch_block = d
                break
    assert B % batch_block == 0, (B, batch_block)
    nb = batch_block
    nsteps = B // nb
    tile = lambda v: jnp.tile(v, nb)

    # ---- 3x3 conv weight: one (nb*C, nb*Cin) block-diagonal bf16 matrix per tap.
    wk = jnp.transpose(params["conv_x_w"], (2, 3, 0, 1))            # (3, 3, C, Cin)
    wc = jnp.stack([_block_diag(wk[kh, kw], nb)
                    for kh in range(3) for kw in range(3)]).astype(jnp.bfloat16)

    # ---- bilinear align_corners=True resize matrix (kron(Lh, Lw)^T), bf16.
    rt = jnp.asarray(build_resize_kron(Hx, Wx, Hy, Wy), dtype=jnp.bfloat16)    # (HWy, HWx)

    # ---- conv_xy weights: bn1/bn2 scale folded into the weights, bn1 bias as extra row.
    w1 = params["w1"].reshape(c2, 4, y_ch)
    w1_big = jnp.concatenate([_block_diag(w1[:, s, :], nb) for s in range(4)], axis=1)
    w1_big = w1_big * tile(params["bn1_s"])[:, None]                # (nb*C2, 4*nb*C)
    w1t = jnp.concatenate([w1_big.T, tile(params["bn1_b"])[None, :]], axis=0)
    w2b = _block_diag(params["w2"], nb) * tile(params["bn2_s"])[:, None]       # (nb*C, nb*C2)

    # ---- packed per-channel operand: [bnx_s, bnx_b, bn2_b, bn3_s*wbn, bn3_b*wbn]
    bnv = jnp.stack([tile(params["bnx_s"]), tile(params["bnx_b"]),
                     tile(params["bn2_b"]),
                     tile(params["bn3_s"] * params["weight_bn"]),
                     tile(params["bn3_b"] * params["weight_bn"])], axis=1)     # (nb*C, 5)

    # ---- data: channel-first (batch folded onto sublanes), bf16 halves the DMA bytes.
    x3 = x_nchw.reshape(nsteps, nb * x_ch, HWx).astype(jnp.bfloat16)
    y3 = y_nchw.reshape(nsteps, nb * y_ch, HWy).astype(jnp.bfloat16)

    const = lambda shape: pl.BlockSpec(shape, lambda b, _z=(0,) * len(shape): _z)
    kernel = functools.partial(_msa_fused_kernel, W=Wx)
    out3 = pl.pallas_call(
        kernel,
        out_shape=jax.ShapeDtypeStruct((nsteps, nb * y_ch, HWx), jnp.float32),
        grid=(nsteps,),
        in_specs=[
            pl.BlockSpec((1, nb * x_ch, HWx), lambda b: (b, 0, 0)),
            pl.BlockSpec((1, nb * y_ch, HWy), lambda b: (b, 0, 0)),
            const((9, nb * y_ch, nb * x_ch)),
            const((HWy, HWx)),
            const((nb * y_ch, 5)),
            const((4 * nb * y_ch + 1, nb * c2)),
            const((nb * y_ch, nb * c2)),
        ],
        out_specs=pl.BlockSpec((1, nb * y_ch, HWx), lambda b: (b, 0, 0)),
        compiler_params=pltpu.CompilerParams(dimension_semantics=("parallel",)),
    )(x3, y3, wc, rt, bnv, w1t, w2b)

    return out3.reshape(B, y_ch, Hx, Wx)


def reference(params, x, y):
    """Pure-JAX reference mirroring the kernel's precision policy (bf16 matmul inputs,
    f32 accumulation) so the comparison isolates kernel correctness."""
    B, _, Hx, Wx = x.shape
    _, C, Hy, Wy = y.shape
    xb = x.astype(jnp.bfloat16).astype(jnp.float32)
    wb = params["conv_x_w"].astype(jnp.bfloat16).astype(jnp.float32)
    xc = lax.conv_general_dilated(xb, wb, (1, 1), "SAME",
                                  dimension_numbers=("NCHW", "OIHW", "NCHW"),
                                  precision=lax.Precision.HIGHEST)
    xc = xc * params["bnx_s"][None, :, None, None] + params["bnx_b"][None, :, None, None]
    xc = jnp.maximum(xc, 0.0)

    rt = jnp.asarray(build_resize_kron(Hx, Wx, Hy, Wy), dtype=jnp.bfloat16)
    rt = rt.astype(jnp.float32)
    yb = y.reshape(B, C, Hy * Wy).astype(jnp.bfloat16).astype(jnp.float32)
    yu = jnp.einsum("bcq,qp->bcp", yb, rt,
                    precision=lax.Precision.HIGHEST).reshape(B, C, Hx, Wx)

    avg_x = jnp.mean(xc, axis=(2, 3)); avg_y = jnp.mean(yu, axis=(2, 3))
    max_x = jnp.max(xc, axis=(2, 3)); max_y = jnp.max(yu, axis=(2, 3))
    att_in = jnp.concatenate([avg_x, avg_y, max_x, max_y], axis=1)      # (B, 4C)

    h = jnp.maximum(jnp.sum(att_in[:, None, :] * params["w1"][None], axis=-1)
                    * params["bn1_s"] + params["bn1_b"], 0.0)           # (B, C2)
    a = (jnp.sum(h[:, None, :] * params["w2"][None], axis=-1)
         * params["bn2_s"] + params["bn2_b"])                           # (B, C)
    z = (a * params["bn3_s"] + params["bn3_b"]) * params["weight_bn"]
    att = jax.nn.sigmoid(z) * a
    att_b = att[:, :, None, None]
    return xc * att_b + yu * (1.0 - att_b)


if __name__ == "__main__":
    B, x_ch, y_ch = 2, 4, 8
    Hx = Wx = 16
    Hy = Wy = 8

    key = jax.random.PRNGKey(0)
    kx, ky = jax.random.split(key)
    x = jax.random.normal(kx, (B, x_ch, Hx, Wx), jnp.float32)
    y = jax.random.normal(ky, (B, y_ch, Hy, Wy), jnp.float32)
    params = init_params(jax.random.PRNGKey(42), x_ch, y_ch)

    ref = reference(params, x, y)

    # default batch_block: >= 2 grid steps (one image / step at B=2)
    out = jax.block_until_ready(multi_scale_attention(params, x, y))
    assert out.shape == (B, y_ch, Hx, Wx), out.shape
    err = float(jnp.max(jnp.abs(out - ref)))
    assert err < 1e-3, f"max abs err {err}"

    # batch-folded path: whole batch in one grid step (block-diagonal weights)
    out2 = jax.block_until_ready(multi_scale_attention(params, x, y, batch_block=B))
    err2 = float(jnp.max(jnp.abs(out2 - ref)))
    assert err2 < 1e-3, f"max abs err (batch-folded) {err2}"

    print("KERNEL_OK")
</pallas_src>

<mosaic_0001>
module attributes {stable_mosaic.version = 11 : i64} {
  func.func @_msa_fused_kernel(%arg0: i32, %arg1: memref<1x4x256xbf16, #tpu.memory_space<vmem>>, %arg2: memref<1x8x64xbf16, #tpu.memory_space<vmem>>, %arg3: memref<9x8x4xbf16, #tpu.memory_space<vmem>>, %arg4: memref<64x256xbf16, #tpu.memory_space<vmem>>, %arg5: memref<8x5xf32, #tpu.memory_space<vmem>>, %arg6: memref<33x4xf32, #tpu.memory_space<vmem>>, %arg7: memref<8x4xf32, #tpu.memory_space<vmem>>, %arg8: memref<1x8x256xf32, #tpu.memory_space<vmem>>) attributes {dimension_semantics = [#tpu.dimension_semantics<parallel>], iteration_bounds = array<i64: 2>, scalar_prefetch = 0 : i64, scratch_operands = 0 : i64, tpu.core_type = #tpu.core_type<tc>, window_params = [{transform_indices = @transform_0, window_bounds = array<i64: 1, 4, 256>}, {transform_indices = @transform_1, window_bounds = array<i64: 1, 8, 64>}, {pipeline_mode = #tpu.pipeline_mode<synchronous>, transform_indices = @transform_2, window_bounds = array<i64: 9, 8, 4>}, {pipeline_mode = #tpu.pipeline_mode<synchronous>, transform_indices = @transform_3, window_bounds = array<i64: 64, 256>}, {pipeline_mode = #tpu.pipeline_mode<synchronous>, transform_indices = @transform_4, window_bounds = array<i64: 8, 5>}, {pipeline_mode = #tpu.pipeline_mode<synchronous>, transform_indices = @transform_5, window_bounds = array<i64: 33, 4>}, {pipeline_mode = #tpu.pipeline_mode<synchronous>, transform_indices = @transform_6, window_bounds = array<i64: 8, 4>}, {transform_indices = @transform_7, window_bounds = array<i64: 1, 8, 256>}]} {
    %c0 = arith.constant 0 : index
    %c0_0 = arith.constant 0 : index
    %c0_1 = arith.constant 0 : index
    %0 = vector.load %arg1[%c0, %c0_0, %c0_1] : memref<1x4x256xbf16, #tpu.memory_space<vmem>>, vector<1x4x256xbf16>
    %1 = vector.shape_cast %0 : vector<1x4x256xbf16> to vector<4x256xbf16>
    %2 = tpu.iota {dimensions = array<i32: 1>} : vector<1x256xi32>
    %c16_i32 = arith.constant 16 : i32
    %c0_i32 = arith.constant 0 : i32
    %3 = arith.cmpi eq, %c16_i32, %c0_i32 : i32
    %c1_i32 = arith.constant 1 : i32
    %4 = arith.select %3, %c1_i32, %c16_i32 : i32
    %5 = vector.broadcast %4 : i32 to vector<1x256xi32>
    %6 = arith.remsi %2, %5 : vector<1x256xi32>
    %c0_i32_2 = arith.constant 0 : i32
    %7 = vector.broadcast %c0_i32_2 : i32 to vector<1x256xi32>
    %8 = arith.cmpi ne, %6, %7 : vector<1x256xi32>
    %c0_i32_3 = arith.constant 0 : i32
    %9 = vector.broadcast %c0_i32_3 : i32 to vector<1x256xi32>
    %10 = arith.cmpi slt, %6, %9 : vector<1x256xi32>
    %c0_i32_4 = arith.constant 0 : i32
    %11 = arith.cmpi slt, %4, %c0_i32_4 : i32
    %12 = vector.broadcast %11 : i1 to vector<1x256xi1>
    %13 = vector.broadcast %12 : vector<1x256xi1> to vector<1x256xi1>
    %14 = arith.xori %10, %13 : vector<1x256xi1>
    %15 = arith.andi %14, %8 : vector<1x256xi1>
    %16 = vector.broadcast %4 : i32 to vector<1x256xi32>
    %17 = arith.addi %6, %16 : vector<1x256xi32>
    %18 = arith.select %15, %17, %6 : vector<1x256xi1>, vector<1x256xi32>
    %c1_i32_5 = arith.constant 1 : i32
    %19 = vector.broadcast %c1_i32_5 : i32 to vector<1x256xi32>
    %20 = arith.cmpi sge, %18, %19 : vector<1x256xi32>
    %c14_i32 = arith.constant 14 : i32
    %21 = vector.broadcast %c14_i32 : i32 to vector<1x256xi32>
    %22 = arith.cmpi sle, %18, %21 : vector<1x256xi32>
    %cst = arith.constant 0.000000e+00 : bf16
    %23 = vector.broadcast %cst : bf16 to vector<4x17xbf16>
    %24 = vector.extract_strided_slice %1 {offsets = [0, 0], sizes = [4, 239], strides = [1, 1]} : vector<4x256xbf16> to vector<4x239xbf16>
    %25 = tpu.concatenate %23, %24 in 1 : vector<4x17xbf16>, vector<4x239xbf16> -> vector<4x256xbf16>
    %c0_i32_6 = arith.constant 0 : i32
    %26 = arith.sitofp %c0_i32_6 : i32 to bf16
    %27 = vector.shape_cast %20 : vector<1x256xi1> to vector<1x256xi1>
    %28 = vector.broadcast %27 : vector<1x256xi1> to vector<4x256xi1>
    %29 = vector.broadcast %26 : bf16 to vector<4x256xbf16>
    %30 = arith.select %28, %25, %29 : vector<4x256xi1>, vector<4x256xbf16>
    %c0_7 = arith.constant 0 : index
    %c0_8 = arith.constant 0 : index
    %c0_9 = arith.constant 0 : index
    %31 = vector.load %arg3[%c0_7, %c0_8, %c0_9] : memref<9x8x4xbf16, #tpu.memory_space<vmem>>, vector<1x8x4xbf16>
    %32 = vector.shape_cast %31 : vector<1x8x4xbf16> to vector<8x4xbf16>
    %cst_10 = arith.constant dense<0.000000e+00> : vector<8x256xf32>
    %33 = tpu.matmul %32, %30, %cst_10 {dimension_numbers = #tpu.dot_dimension_numbers<[1], [0], [0], [1], [0, 0, 1, 1], [], []>} : vector<8x4xbf16>, vector<4x256xbf16>, vector<8x256xf32> -> vector<8x256xf32>
    %cst_11 = arith.constant 0.000000e+00 : bf16
    %34 = vector.broadcast %cst_11 : bf16 to vector<4x16xbf16>
    %35 = vector.extract_strided_slice %1 {offsets = [0, 0], sizes = [4, 240], strides = [1, 1]} : vector<4x256xbf16> to vector<4x240xbf16>
    %36 = tpu.concatenate %34, %35 in 1 : vector<4x16xbf16>, vector<4x240xbf16> -> vector<4x256xbf16>
    %c1 = arith.constant 1 : index
    %c0_12 = arith.constant 0 : index
    %c0_13 = arith.constant 0 : index
    %37 = vector.load %arg3[%c1, %c0_12, %c0_13] : memref<9x8x4xbf16, #tpu.memory_space<vmem>>, vector<1x8x4xbf16>
    %38 = vector.shape_cast %37 : vector<1x8x4xbf16> to vector<8x4xbf16>
    %cst_14 = arith.constant dense<0.000000e+00> : vector<8x256xf32>
    %39 = tpu.matmul %38, %36, %cst_14 {dimension_numbers = #tpu.dot_dimension_numbers<[1], [0], [0], [1], [0, 0, 1, 1], [], []>} : vector<8x4xbf16>, vector<4x256xbf16>, vector<8x256xf32> -> vector<8x256xf32>
    %40 = arith.addf %33, %39 : vector<8x256xf32>
    %cst_15 = arith.constant 0.000000e+00 : bf16
    %41 = vector.broadcast %cst_15 : bf16 to vector<4x15xbf16>
    %42 = vector.extract_strided_slice %1 {offsets = [0, 0], sizes = [4, 241], strides = [1, 1]} : vector<4x256xbf16> to vector<4x241xbf16>
    %43 = tpu.concatenate %41, %42 in 1 : vector<4x15xbf16>, vector<4x241xbf16> -> vector<4x256xbf16>
    %c0_i32_16 = arith.constant 0 : i32
    %44 = arith.sitofp %c0_i32_16 : i32 to bf16
    %45 = vector.shape_cast %22 : vector<1x256xi1> to vector<1x256xi1>
    %46 = vector.broadcast %45 : vector<1x256xi1> to vector<4x256xi1>
    %47 = vector.broadcast %44 : bf16 to vector<4x256xbf16>
    %48 = arith.select %46, %43, %47 : vector<4x256xi1>, vector<4x256xbf16>
    %c2 = arith.constant 2 : index
    %c0_17 = arith.constant 0 : index
    %c0_18 = arith.constant 0 : index
    %49 = vector.load %arg3[%c2, %c0_17, %c0_18] : memref<9x8x4xbf16, #tpu.memory_space<vmem>>, vector<1x8x4xbf16>
    %50 = vector.shape_cast %49 : vector<1x8x4xbf16> to vector<8x4xbf16>
    %cst_19 = arith.constant dense<0.000000e+00> : vector<8x256xf32>
    %51 = tpu.matmul %50, %48, %cst_19 {dimension_numbers = #tpu.dot_dimension_numbers<[1], [0], [0], [1], [0, 0, 1, 1], [], []>} : vector<8x4xbf16>, vector<4x256xbf16>, vector<8x256xf32> -> vector<8x256xf32>
    %52 = arith.addf %40, %51 : vector<8x256xf32>
    %cst_20 = arith.constant 0.000000e+00 : bf16
    %53 = vector.broadcast %cst_20 : bf16 to vector<4x1xbf16>
    %54 = vector.extract_strided_slice %1 {offsets = [0, 0], sizes = [4, 255], strides = [1, 1]} : vector<4x256xbf16> to vector<4x255xbf16>
    %55 = tpu.concatenate %53, %54 in 1 : vector<4x1xbf16>, vector<4x255xbf16> -> vector<4x256xbf16>
    %c0_i32_21 = arith.constant 0 : i32
    %56 = arith.sitofp %c0_i32_21 : i32 to bf16
    %57 = vector.shape_cast %20 : vector<1x256xi1> to vector<1x256xi1>
    %58 = vector.broadcast %57 : vector<1x256xi1> to vector<4x256xi1>
    %59 = vector.broadcast %56 : bf16 to vector<4x256xbf16>
    %60 = arith.select %58, %55, %59 : vector<4x256xi1>, vector<4x256xbf16>
    %c3 = arith.constant 3 : index
    %c0_22 = arith.constant 0 : index
    %c0_23 = arith.constant 0 : index
    %61 = vector.load %arg3[%c3, %c0_22, %c0_23] : memref<9x8x4xbf16, #tpu.memory_space<vmem>>, vector<1x8x4xbf16>
    %62 = vector.shape_cast %61 : vector<1x8x4xbf16> to vector<8x4xbf16>
    %cst_24 = arith.constant dense<0.000000e+00> : vector<8x256xf32>
    %63 = tpu.matmul %62, %60, %cst_24 {dimension_numbers = #tpu.dot_dimension_numbers<[1], [0], [0], [1], [0, 0, 1, 1], [], []>} : vector<8x4xbf16>, vector<4x256xbf16>, vector<8x256xf32> -> vector<8x256xf32>
    %64 = arith.addf %52, %63 : vector<8x256xf32>
    %c4 = arith.constant 4 : index
    %c0_25 = arith.constant 0 : index
    %c0_26 = arith.constant 0 : index
    %65 = vector.load %arg3[%c4, %c0_25, %c0_26] : memref<9x8x4xbf16, #tpu.memory_space<vmem>>, vector<1x8x4xbf16>
    %66 = vector.shape_cast %65 : vector<1x8x4xbf16> to vector<8x4xbf16>
    %cst_27 = arith.constant dense<0.000000e+00> : vector<8x256xf32>
    %67 = tpu.matmul %66, %1, %cst_27 {dimension_numbers = #tpu.dot_dimension_numbers<[1], [0], [0], [1], [0, 0, 1, 1], [], []>} : vector<8x4xbf16>, vector<4x256xbf16>, vector<8x256xf32> -> vector<8x256xf32>
    %68 = arith.addf %64, %67 : vector<8x256xf32>
    %69 = vector.extract_strided_slice %1 {offsets = [0, 1], sizes = [4, 255], strides = [1, 1]} : vector<4x256xbf16> to vector<4x255xbf16>
    %cst_28 = arith.constant 0.000000e+00 : bf16
    %70 = vector.broadcast %cst_28 : bf16 to vector<4x1xbf16>
    %71 = tpu.concatenate %69, %70 in 1 : vector<4x255xbf16>, vector<4x1xbf16> -> vector<4x256xbf16>
    %c0_i32_29 = arith.constant 0 : i32
    %72 = arith.sitofp %c0_i32_29 : i32 to bf16
    %73 = vector.shape_cast %22 : vector<1x256xi1> to vector<1x256xi1>
    %74 = vector.broadcast %73 : vector<1x256xi1> to vector<4x256xi1>
    %75 = vector.broadcast %72 : bf16 to vector<4x256xbf16>
    %76 = arith.select %74, %71, %75 : vector<4x256xi1>, vector<4x256xbf16>
    %c5 = arith.constant 5 : index
    %c0_30 = arith.constant 0 : index
    %c0_31 = arith.constant 0 : index
    %77 = vector.load %arg3[%c5, %c0_30, %c0_31] : memref<9x8x4xbf16, #tpu.memory_space<vmem>>, vector<1x8x4xbf16>
    %78 = vector.shape_cast %77 : vector<1x8x4xbf16> to vector<8x4xbf16>
    %cst_32 = arith.constant dense<0.000000e+00> : vector<8x256xf32>
    %79 = tpu.matmul %78, %76, %cst_32 {dimension_numbers = #tpu.dot_dimension_numbers<[1], [0], [0], [1], [0, 0, 1, 1], [], []>} : vector<8x4xbf16>, vector<4x256xbf16>, vector<8x256xf32> -> vector<8x256xf32>
    %80 = arith.addf %68, %79 : vector<8x256xf32>
    %81 = vector.extract_strided_slice %1 {offsets = [0, 15], sizes = [4, 241], strides = [1, 1]} : vector<4x256xbf16> to vector<4x241xbf16>
    %cst_33 = arith.constant 0.000000e+00 : bf16
    %82 = vector.broadcast %cst_33 : bf16 to vector<4x15xbf16>
    %83 = tpu.concatenate %81, %82 in 1 : vector<4x241xbf16>, vector<4x15xbf16> -> vector<4x256xbf16>
    %c0_i32_34 = arith.constant 0 : i32
    %84 = arith.sitofp %c0_i32_34 : i32 to bf16
    %85 = vector.shape_cast %20 : vector<1x256xi1> to vector<1x256xi1>
    %86 = vector.broadcast %85 : vector<1x256xi1> to vector<4x256xi1>
    %87 = vector.broadcast %84 : bf16 to vector<4x256xbf16>
    %88 = arith.select %86, %83, %87 : vector<4x256xi1>, vector<4x256xbf16>
    %c6 = arith.constant 6 : index
    %c0_35 = arith.constant 0 : index
    %c0_36 = arith.constant 0 : index
    %89 = vector.load %arg3[%c6, %c0_35, %c0_36] : memref<9x8x4xbf16, #tpu.memory_space<vmem>>, vector<1x8x4xbf16>
    %90 = vector.shape_cast %89 : vector<1x8x4xbf16> to vector<8x4xbf16>
    %cst_37 = arith.constant dense<0.000000e+00> : vector<8x256xf32>
    %91 = tpu.matmul %90, %88, %cst_37 {dimension_numbers = #tpu.dot_dimension_numbers<[1], [0], [0], [1], [0, 0, 1, 1], [], []>} : vector<8x4xbf16>, vector<4x256xbf16>, vector<8x256xf32> -> vector<8x256xf32>
    %92 = arith.addf %80, %91 : vector<8x256xf32>
    %93 = vector.extract_strided_slice %1 {offsets = [0, 16], sizes = [4, 240], strides = [1, 1]} : vector<4x256xbf16> to vector<4x240xbf16>
    %cst_38 = arith.constant 0.000000e+00 : bf16
    %94 = vector.broadcast %cst_38 : bf16 to vector<4x16xbf16>
    %95 = tpu.concatenate %93, %94 in 1 : vector<4x240xbf16>, vector<4x16xbf16> -> vector<4x256xbf16>
    %c7 = arith.constant 7 : index
    %c0_39 = arith.constant 0 : index
    %c0_40 = arith.constant 0 : index
    %96 = vector.load %arg3[%c7, %c0_39, %c0_40] : memref<9x8x4xbf16, #tpu.memory_space<vmem>>, vector<1x8x4xbf16>
    %97 = vector.shape_cast %96 : vector<1x8x4xbf16> to vector<8x4xbf16>
    %cst_41 = arith.constant dense<0.000000e+00> : vector<8x256xf32>
    %98 = tpu.matmul %97, %95, %cst_41 {dimension_numbers = #tpu.dot_dimension_numbers<[1], [0], [0], [1], [0, 0, 1, 1], [], []>} : vector<8x4xbf16>, vector<4x256xbf16>, vector<8x256xf32> -> vector<8x256xf32>
    %99 = arith.addf %92, %98 : vector<8x256xf32>
    %100 = vector.extract_strided_slice %1 {offsets = [0, 17], sizes = [4, 239], strides = [1, 1]} : vector<4x256xbf16> to vector<4x239xbf16>
    %cst_42 = arith.constant 0.000000e+00 : bf16
    %101 = vector.broadcast %cst_42 : bf16 to vector<4x17xbf16>
    %102 = tpu.concatenate %100, %101 in 1 : vector<4x239xbf16>, vector<4x17xbf16> -> vector<4x256xbf16>
    %c0_i32_43 = arith.constant 0 : i32
    %103 = arith.sitofp %c0_i32_43 : i32 to bf16
    %104 = vector.shape_cast %22 : vector<1x256xi1> to vector<1x256xi1>
    %105 = vector.broadcast %104 : vector<1x256xi1> to vector<4x256xi1>
    %106 = vector.broadcast %103 : bf16 to vector<4x256xbf16>
    %107 = arith.select %105, %102, %106 : vector<4x256xi1>, vector<4x256xbf16>
    %c8 = arith.constant 8 : index
    %c0_44 = arith.constant 0 : index
    %c0_45 = arith.constant 0 : index
    %108 = vector.load %arg3[%c8, %c0_44, %c0_45] : memref<9x8x4xbf16, #tpu.memory_space<vmem>>, vector<1x8x4xbf16>
    %109 = vector.shape_cast %108 : vector<1x8x4xbf16> to vector<8x4xbf16>
    %cst_46 = arith.constant dense<0.000000e+00> : vector<8x256xf32>
    %110 = tpu.matmul %109, %107, %cst_46 {dimension_numbers = #tpu.dot_dimension_numbers<[1], [0], [0], [1], [0, 0, 1, 1], [], []>} : vector<8x4xbf16>, vector<4x256xbf16>, vector<8x256xf32> -> vector<8x256xf32>
    %111 = arith.addf %99, %110 : vector<8x256xf32>
    %c0_47 = arith.constant 0 : index
    %c0_48 = arith.constant 0 : index
    %112 = vector.load %arg5[%c0_47, %c0_48] : memref<8x5xf32, #tpu.memory_space<vmem>>, vector<8x5xf32>
    %113 = vector.extract_strided_slice %112 {offsets = [0, 0], sizes = [8, 1], strides = [1, 1]} : vector<8x5xf32> to vector<8x1xf32>
    %114 = vector.broadcast %113 : vector<8x1xf32> to vector<8x256xf32>
    %115 = arith.mulf %111, %114 : vector<8x256xf32>
    %116 = vector.extract_strided_slice %112 {offsets = [0, 1], sizes = [8, 1], strides = [1, 1]} : vector<8x5xf32> to vector<8x1xf32>
    %117 = vector.broadcast %116 : vector<8x1xf32> to vector<8x256xf32>
    %118 = arith.addf %115, %117 : vector<8x256xf32>
    %cst_49 = arith.constant 0.000000e+00 : f32
    %119 = vector.broadcast %cst_49 : f32 to vector<8x256xf32>
    %120 = arith.maximumf %118, %119 : vector<8x256xf32>
    %c0_50 = arith.constant 0 : index
    %c0_51 = arith.constant 0 : index
    %c0_52 = arith.constant 0 : index
    %121 = vector.load %arg2[%c0_50, %c0_51, %c0_52] : memref<1x8x64xbf16, #tpu.memory_space<vmem>>, vector<1x8x64xbf16>
    %122 = vector.shape_cast %121 : vector<1x8x64xbf16> to vector<8x64xbf16>
    %c0_53 = arith.constant 0 : index
    %c0_54 = arith.constant 0 : index
    %123 = vector.load %arg4[%c0_53, %c0_54] : memref<64x256xbf16, #tpu.memory_space<vmem>>, vector<64x256xbf16>
    %cst_55 = arith.constant dense<0.000000e+00> : vector<8x256xf32>
    %124 = tpu.matmul %122, %123, %cst_55 {dimension_numbers = #tpu.dot_dimension_numbers<[1], [0], [0], [1], [0, 0, 1, 1], [], []>} : vector<8x64xbf16>, vector<64x256xbf16>, vector<8x256xf32> -> vector<8x256xf32>
    %cst_56 = arith.constant dense<0.000000e+00> : vector<8xf32>
    %125 = vector.multi_reduction <add>, %120, %cst_56 [1] : vector<8x256xf32> to vector<8xf32>
    %126 = vector.shape_cast %125 : vector<8xf32> to vector<8x1xf32>
    %cst_57 = arith.constant 2.560000e+02 : f32
    %127 = vector.broadcast %cst_57 : f32 to vector<8x1xf32>
    %128 = arith.divf %126, %127 : vector<8x1xf32>
    %cst_58 = arith.constant dense<0.000000e+00> : vector<8xf32>
    %129 = vector.multi_reduction <add>, %124, %cst_58 [1] : vector<8x256xf32> to vector<8xf32>
    %130 = vector.shape_cast %129 : vector<8xf32> to vector<8x1xf32>
    %cst_59 = arith.constant 2.560000e+02 : f32
    %131 = vector.broadcast %cst_59 : f32 to vector<8x1xf32>
    %132 = arith.divf %130, %131 : vector<8x1xf32>
    %cst_60 = arith.constant dense<0xFF800000> : vector<8xf32>
    %133 = vector.multi_reduction <maximumf>, %120, %cst_60 [1] : vector<8x256xf32> to vector<8xf32>
    %134 = vector.shape_cast %133 : vector<8xf32> to vector<8x1xf32>
    %cst_61 = arith.constant dense<0xFF800000> : vector<8xf32>
    %135 = vector.multi_reduction <maximumf>, %124, %cst_61 [1] : vector<8x256xf32> to vector<8xf32>
    %136 = vector.shape_cast %135 : vector<8xf32> to vector<8x1xf32>
    %cst_62 = arith.constant 1.000000e+00 : f32
    %137 = vector.broadcast %cst_62 : f32 to vector<1x1xf32>
    %138 = tpu.concatenate %128, %132, %134, %136, %137 in 0 : vector<8x1xf32>, vector<8x1xf32>, vector<8x1xf32>, vector<8x1xf32>, vector<1x1xf32> -> vector<33x1xf32>
    %c0_63 = arith.constant 0 : index
    %c0_64 = arith.constant 0 : index
    %139 = vector.load %arg6[%c0_63, %c0_64] : memref<33x4xf32, #tpu.memory_space<vmem>>, vector<33x4xf32>
    %140 = vector.broadcast %138 : vector<33x1xf32> to vector<33x4xf32>
    %141 = arith.mulf %139, %140 : vector<33x4xf32>
    %cst_65 = arith.constant dense<0.000000e+00> : vector<4xf32>
    %142 = vector.multi_reduction <add>, %141, %cst_65 [0] : vector<33x4xf32> to vector<4xf32>
    %143 = vector.shape_cast %142 : vector<4xf32> to vector<1x4xf32>
    %cst_66 = arith.constant 0.000000e+00 : f32
    %144 = vector.broadcast %cst_66 : f32 to vector<1x4xf32>
    %145 = arith.maximumf %143, %144 : vector<1x4xf32>
    %c0_67 = arith.constant 0 : index
    %c0_68 = arith.constant 0 : index
    %146 = vector.load %arg7[%c0_67, %c0_68] : memref<8x4xf32, #tpu.memory_space<vmem>>, vector<8x4xf32>
    %147 = vector.broadcast %145 : vector<1x4xf32> to vector<8x4xf32>
    %148 = arith.mulf %146, %147 : vector<8x4xf32>
    %cst_69 = arith.constant dense<0.000000e+00> : vector<8xf32>
    %149 = vector.multi_reduction <add>, %148, %cst_69 [1] : vector<8x4xf32> to vector<8xf32>
    %150 = vector.shape_cast %149 : vector<8xf32> to vector<8x1xf32>
    %151 = vector.extract_strided_slice %112 {offsets = [0, 2], sizes = [8, 1], strides = [1, 1]} : vector<8x5xf32> to vector<8x1xf32>
    %152 = arith.addf %150, %151 : vector<8x1xf32>
    %153 = vector.extract_strided_slice %112 {offsets = [0, 3], sizes = [8, 1], strides = [1, 1]} : vector<8x5xf32> to vector<8x1xf32>
    %154 = arith.mulf %152, %153 : vector<8x1xf32>
    %155 = vector.extract_strided_slice %112 {offsets = [0, 4], sizes = [8, 1], strides = [1, 1]} : vector<8x5xf32> to vector<8x1xf32>
    %156 = arith.addf %154, %155 : vector<8x1xf32>
    %157 = arith.negf %156 : vector<8x1xf32>
    %158 = math.exp %157 : vector<8x1xf32>
    %cst_70 = arith.constant 1.000000e+00 : f32
    %159 = vector.broadcast %cst_70 : f32 to vector<8x1xf32>
    %160 = arith.addf %159, %158 : vector<8x1xf32>
    %161 = arith.divf %159, %160 : vector<8x1xf32>
    %162 = arith.mulf %161, %152 : vector<8x1xf32>
    %163 = arith.subf %120, %124 : vector<8x256xf32>
    %164 = vector.broadcast %162 : vector<8x1xf32> to vector<8x256xf32>
    %165 = arith.mulf %164, %163 : vector<8x256xf32>
    %166 = arith.addf %124, %165 : vector<8x256xf32>
    %c0_71 = arith.constant 0 : index
    %c0_72 = arith.constant 0 : index
    %c0_73 = arith.constant 0 : index
    %167 = vector.load %arg8[%c0_71, %c0_72, %c0_73] : memref<1x8x256xf32, #tpu.memory_space<vmem>>, vector<1x8x256xf32>
    %168 = vector.shape_cast %167 : vector<1x8x256xf32> to vector<8x256xf32>
    %169 = vector.shape_cast %166 : vector<8x256xf32> to vector<1x8x256xf32>
    tpu.vector_store %arg8[%c0_71, %c0_72, %c0_73], %169 {strides = array<i32>} : memref<1x8x256xf32, #tpu.memory_space<vmem>>, vector<1x8x256xf32>,
    return
  }
  func.func @transform_0(%arg0: i32) -> (i32, i32, i32) {
    %c0_i32 = arith.constant 0 : i32
    %c0_i32_0 = arith.constant 0 : i32
    %c0_i32_1 = arith.constant 0 : i32
    return %arg0, %c0_i32, %c0_i32_0 : i32, i32, i32
  }
  func.func @transform_1(%arg0: i32) -> (i32, i32, i32) {
    %c0_i32 = arith.constant 0 : i32
    %c0_i32_0 = arith.constant 0 : i32
    %c0_i32_1 = arith.constant 0 : i32
    return %arg0, %c0_i32, %c0_i32_0 : i32, i32, i32
  }
  func.func @transform_2(%arg0: i32) -> (i32, i32, i32) {
    %c0_i32 = arith.constant 0 : i32
    %c0_i32_0 = arith.constant 0 : i32
    %c0_i32_1 = arith.constant 0 : i32
    %c0_i32_2 = arith.constant 0 : i32
    return %c0_i32, %c0_i32_0, %c0_i32_1 : i32, i32, i32
  }
  func.func @transform_3(%arg0: i32) -> (i32, i32) {
    %c0_i32 = arith.constant 0 : i32
    %c0_i32_0 = arith.constant 0 : i32
    %c0_i32_1 = arith.constant 0 : i32
    return %c0_i32, %c0_i32_0 : i32, i32
  }
  func.func @transform_4(%arg0: i32) -> (i32, i32) {
    %c0_i32 = arith.constant 0 : i32
    %c0_i32_0 = arith.constant 0 : i32
    %c0_i32_1 = arith.constant 0 : i32
    return %c0_i32, %c0_i32_0 : i32, i32
  }
  func.func @transform_5(%arg0: i32) -> (i32, i32) {
    %c0_i32 = arith.constant 0 : i32
    %c0_i32_0 = arith.constant 0 : i32
    %c0_i32_1 = arith.constant 0 : i32
    return %c0_i32, %c0_i32_0 : i32, i32
  }
  func.func @transform_6(%arg0: i32) -> (i32, i32) {
    %c0_i32 = arith.constant 0 : i32
    %c0_i32_0 = arith.constant 0 : i32
    %c0_i32_1 = arith.constant 0 : i32
    return %c0_i32, %c0_i32_0 : i32, i32
  }
  func.func @transform_7(%arg0: i32) -> (i32, i32, i32) {
    %c0_i32 = arith.constant 0 : i32
    %c0_i32_0 = arith.constant 0 : i32
    %c0_i32_1 = arith.constant 0 : i32
    return %arg0, %c0_i32, %c0_i32_0 : i32, i32, i32
  }
}

</mosaic_0001>

<bundles_post_ra>
// kernel: tpu_custom_call.1
= control target key start
LH: loop header
LB: loop body
LE: loop exit
PB: predicated region body
PF: predicated region fallthrough
CT: control target
= control target key end

     0   :  { %12 = vsyncpa [#allocation3], 0  ;;  %s1798_s0 = inlined_call_operand.vmem [shape: bf16[2,4,256], index: 0, kind: input, shape index: {}]   ;;  %s1799_s1 = inlined_call_operand.vmem [shape: bf16[2,8,64], index: 1, kind: input, shape index: {}]   ;;  %s1800_s2 = inlined_call_operand.vmem [shape: bf16[9,8,4], index: 2, kind: input, shape index: {}]   ;;  %s1801_s3 = inlined_call_operand.vmem [shape: bf16[64,256], index: 3, kind: input, shape index: {}]   ;;  %s1802_s4 = inlined_call_operand.vmem [shape: f32[8,5], index: 4, kind: input, shape index: {}]   ;;  %s1803_s5 = inlined_call_operand.vmem [shape: f32[33,4], index: 5, kind: input, shape index: {}]   ;;  %s1804_s6 = inlined_call_operand.vmem [shape: f32[8,4], index: 6, kind: input, shape index: {}]   ;;  %s1805_s7 = inlined_call_operand.hbm [shape: f32[2,8,256], index: 7, kind: output, shape index: {}]  }
   0x1   :  { %14 = vsyncpa [#allocation3 + $0x1], 0  ;;  %s1483_s24 = smov 0   ;;  %s1485_s25 = smov 0  }
   0x2   :  { %s1487_s26 = smov 0   ;;  %s1489_s27 = smov 0  }
   0x3 LB: > { %s1504_s28 = sadd.s32 4294967295, %s1428_s27   ;;  %s1245_s29 = sadd.s32 4294967294, %s1428_s27   ;;  %s1428_s27 = sphi %s1489_s27, %s1811_s27   ;;  %s1424_s26 = sphi %s1487_s26, %s1810_s26   ;;  %s1420_s25 = sphi %s1485_s25, %s1809_s25   ;;  %s1416_s24 = sphi %s1483_s24, %s1808_s24  }
   0x4   : > { %s1508_s30 = sadd.s32 1, %s1428_s27   ;;  %s184_s8 = sadd.s32 1, %s1424_s26 }
   0x5   : > { %s181_s9 = ssub.s32 %s1428_s27, %s1508_s30  ;;  %p194_p0 = scmp.ne.s32.totalorder %s1424_s26, %s1420_s25 }
   0x6   : > { %p182_p1 = scmp.eq.s32.totalorder %s181_s9, 0  ;;  %p195_p2 = scmp.eq.s32.totalorder %s1504_s28, 1 }
   0x7   : > { %p200_p3 = scmp.ne.s32.totalorder %s1420_s25, %s1416_s24  ;;  %p201_p4 = scmp.eq.s32.totalorder %s1245_s29, 1 }
   0x8   : > { %s1519_s10 = scalar_select %p182_p1, %s1424_s26, %s184_s8  }
   0x9   : > { %p1521_p5 = por %p195_p2, %p194_p0  ;;  %p1525_p6 = por %p201_p4, %p200_p3 }
   0xa   : > { %p1248_p7 = scmp.ge.s32.totalorder %s1428_s27, 1  ;;  %p249_p8 = scmp.lt.s32.totalorder %s1428_s27, 3 }
   0xc   : > { %p250_p9 = pnand %p1248_p7, %p249_p8 }
   0xd   : > { %p285_p10 = scmp.lt.s32.totalorder (!%p250_p9), %s1504_s28, 1  ;;  %s1431_s18 = smov (!%p250_p9), 16  }
   0xe   : > { %253 = sbr.rel (%p250_p9) target bundleno = 999 (0x3e7), region = 48  ;;  %s1432_s19 = smov (!%p250_p9), 17  }
   0xf   : > { %s1433_s20 = smov (!%p250_p9), 15   ;;  %s1434_s21 = smov (!%p250_p9), 1  }
  0x10   : > { %s1435_s22 = smov (!%p250_p9), 127   ;;  %s1436_s23 = smov (!%p250_p9), 113  }
  0x11   : > { %s1437_s29 = smov (!%p250_p9), 112   ;;  %s1438_s8 = smov (!%p250_p9), 111  }
  0x13   : > { %s1533_s13 = scalar_select %p285_p10, %s1504_s28, 1  ;;  %v1430_v0 = vmov 0   ;;  %v1571_v3 = vld [vmem:[%s1802_s4] sm:$0xff]  ;;  %v1439_v4 = vmov 1   ;;  %v298_v5 = vlaneseq  ;;  %vm342_vm6 = vcmask 138240  }
  0x14   : > { %422 = vmatprep.mubr.bf16.mxu0 %v1430_v0  ;;  %472 = vmatprep.mubr.bf16.mxu1 %v1430_v0  ;;  %vm373_vm7 = vcmask 130048   ;;  %vm384_vm9 = vcmask 1041408   ;;  %vm485_vm11 = vcmask 121856   ;;  %v1254_v31 = vld [vmem:[%s1800_s2 + $0x4] sm:$0xf]  ;;  %vm380_vm14 = vcmask 31744  }
  0x15   : > { %1348 = vset.pattern.permute.xlu0 %v1430_v0  ;;  %s1295_s14 = sshll.u32 %s1533_s13, 2  ;;  %1349 = vset.pattern.permute.xlu1 %v1439_v4  ;;  %v299_v6 = vand.u32 127, %v298_v5  ;;  %v357_v10 = vshrl.u32 %v298_v5, 7  ;;  %v368_v34 = vld [vmem:[%s1800_s2] sm:$0xf]  ;;  %vm568_vm15 = vcmask 7168  }
  0x16   : > { %s289_s17 = scalar_lea.vmem %s1798_s0, %s1295_s14  ;;  %v1259_v47 = vld [vmem:[%s1800_s2 + $0x8] sm:$0xf]  ;;  %v1262_v48 = vld [vmem:[%s1800_s2 + $0xc] sm:$0xf]  ;;  %v1265_v63 = vld [vmem:[%s1800_s2 + $0x10] sm:$0xf] }
  0x17   : > { %v1544_v1 = vld.sshfl [vmem:[%s289_s17] sm:$0x33 pattern:$0x76325410]  ;;  %v300_v7 = vadd.s32 128, %v299_v6  ;;  %v305_v8 = vand.u32 15, %v299_v6 }
  0x18   : > { %369 = vrot.lane.b32.xlu1 %v1544_v1, %s1431_s18  ;;  %338 = vrot.lane.b32.xlu0 %v1544_v1, %s1432_s19  ;;  %v1550_v2 = vcombine.high %v1544_v1, %v1544_v1  ;;  %v358_v11 = vsub.s32 0, %v357_v10  ;;  %v362_v13 = vsub.s32 4, %v357_v10  ;;  %v637_v51 = vsel %vm384_vm9, %v1544_v1, 0  ;;  %s1440_s13 = smov 126  }
  0x19   : > { %v312_v9 = vand.u32 15, %v300_v7  ;;  %vm325_vm0 = vcmp.ge.s32.totalorder %v305_v8, 1  ;;  %vm327_vm3 = vcmp.le.s32.totalorder %v305_v8, 14  ;;  %v1354_v8 = vld [vmem:[%s1801_s3 + $0x34] ss:$8 sps:$4 sm:$0xff]  }
  0x1b   : > { %vm326_vm1 = vcmp.ge.s32.totalorder %v312_v9, 1  ;;  %vm328_vm4 = vcmp.le.s32.totalorder %v312_v9, 14 }
  0x1c   : > { %371 = vrot.lane.b32.xlu1 %v1550_v2, %s1431_s18  ;;  %340 = vrot.lane.b32.xlu0 %v1550_v2, %s1432_s19  ;;  %vm354_vm2 = vmpackc.low %vm326_vm1, %vm325_vm0  ;;  %vm689_vm0 = vcmask 1039360   ;;  %vm756_vm1 = vcmask 924672   ;;  %s293_s19 = scalar_lea.vmem %s1799_s1, %s1295_s14  ;;  %s1296_s14 = sshll.u32 %s1504_s28, 8 }
  0x1d   : > { %v355_v12 = vsel %vm354_vm2, 65537, %v1430_v0  ;;  %vm496_vm5 = vmpackc.low %vm328_vm4, %vm327_vm3  ;;  %vm823_vm2 = vcmask 916480   ;;  %vm885_vm3 = vcmask 908288   ;;  %vm1013_vm4 = vcmask 523264   ;;  %s1442_s28 = smov [#allocation2]  }
  0x1e   : > { %v1577_v14 = vrot.slane %v355_v12, %v358_v11  ;;  %v1579_v15 = vrot.slane %v355_v12, %v362_v13  ;;  %v497_v18 = vsel %vm496_vm5, 65537, %v1430_v0  ;;  %vm1115_vm5 = vcmask 24576   ;;  %s1372_s15 = sshll.u32 %s1442_s28, 4  ;;  %s1373_s15 = int_to_ptr.vmem [resolvable:$false] %s1372_s15 }
  0x1f   : > { %v1585_v21 = vrot.slane %v497_v18, %v358_v11  ;;  %v1587_v22 = vrot.slane %v497_v18, %v362_v13  ;;  %v1274_v18 = vld [vmem:[%s1800_s2 + $0x1c] sm:$0xf]  ;;  %s1374_s16 = scalar_lea.vmem %s1373_s15, 512 }
  0x20   : > { %483 = vrot.lane.b32.xlu1 %v1550_v2, %s1433_s20  ;;  %481 = vrot.lane.b32.xlu0 %v1544_v1, %s1433_s20  ;;  %vm364_vm8 = vcmp.ne.s16.totalorder %v1577_v14, 0  ;;  %vm365_vm10 = vcmp.ne.s16.totalorder %v1579_v15, 0 }
  0x21   : > { %vm506_vm12 = vcmp.ne.s16.totalorder %v1585_v21, 0  ;;  %vm507_vm13 = vcmp.ne.s16.totalorder %v1587_v22, 0  ;;  %v1355_v21 = vld [vmem:[%s1801_s3 + $0x20] ss:$8 sps:$4 sm:$0xff]   ;;  %v1360_v22 = vld [vmem:[%s1801_s3 + $0x14] ss:$8 sps:$4 sm:$0xff]  }
  0x24   : > { %566 = vrot.lane.b32.xlu1 %v1550_v2, %s1434_s21  ;;  %564 = vrot.lane.b32.xlu0 %v1544_v1, %s1434_s21 }
  0x28   : > { %687 = vrot.lane.b32.xlu1 %v1550_v2, %s1435_s22  ;;  %685 = vrot.lane.b32.xlu0 %v1544_v1, %s1435_s22 }
  0x2c   : > { %754 = vrot.lane.b32.xlu1 %v1550_v2, %s1436_s23  ;;  %752 = vrot.lane.b32.xlu0 %v1544_v1, %s1436_s23 }
  0x30   : > { %821 = vrot.lane.b32.xlu1 %v1550_v2, %s1437_s29  ;;  %819 = vrot.lane.b32.xlu0 %v1544_v1, %s1437_s29 }
  0x34   : > { %883 = vrot.lane.b32.xlu1 %v1550_v2, %s1438_s8  ;;  %881 = vrot.lane.b32.xlu0 %v1544_v1, %s1438_s8  ;;  %v1268_v1 = vld [vmem:[%s1800_s2 + $0x14] sm:$0xf]  ;;  %s1763_s8 = scalar_lea.hbm %s1805_s7, %s1296_s14 }
  0x38   : > { %951 = vperm.xlu0 %1348, %v1571_v3   ;;  %957 = vperm.xlu1 %1349, %v1571_v3  }
  0x3c   : > { %1350 = vset.pattern.permute.xlu1 %v1430_v0 }
  0x8a   : > { %v370_v16 = vpop.permute.xlu1 %369  ;;  %v339_v17 = vpop.permute.xlu0 %338 }
  0x8b   : > { %v348_v19 = vsel %vm342_vm6, 0, %v339_v17  ;;  %v377_v20 = vsel %vm373_vm7, 0, %v370_v16 }
  0x8c   : > { %v366_v25 = vsel %vm364_vm8, %v348_v19, 0  ;;  %v385_v28 = vsel %vm384_vm9, %v377_v20, 0  ;;  %v1357_v20 = vld [vmem:[%s1801_s3 + $0x24] ss:$8 sps:$4 sm:$0xff]  }
  0x8d   : > { %v435_v30 = vsel %vm384_vm9, %v366_v25, 0  ;;  %v1363_v25 = vld [vmem:[%s1801_s3 + $0x4] ss:$8 sps:$4 sm:$0xff]  }
  0x8e   : > { %v372_v23 = vpop.permute.xlu1 %371  ;;  %v341_v24 = vpop.permute.xlu0 %340 }
  0x8f   : > { %v374_v26 = vsel %vm373_vm7, %v370_v16, %v372_v23  ;;  %v343_v27 = vsel %vm342_vm6, %v339_v17, %v341_v24  ;;  %v1271_v16 = vld [vmem:[%s1800_s2 + $0x18] sm:$0xf]  ;;  %v1277_v23 = vld [vmem:[%s1800_s2 + $0x20] sm:$0xf] }
  0x90   : > { %1255 = vmatprep.subr.msk.bf16.mxu0 %vm384_vm9, %v374_v26  ;;  %v367_v29 = vsel %vm365_vm10, %v343_v27, 0  ;;  %v1352_v17 = vld [vmem:[%s1801_s3 + $0x30] ss:$8 sps:$4 sm:$0xff]   ;;  %v964_v26 = vld [vmem:[%s293_s19] sm:$0xf]  ;;  %s282_s19 = sand.u32 1, %s1420_s25  }
  0x91   : > { %405 = vmatpush1.bf16.msra.mxu0 %v385_v28  ;;  %1257 = vmatprep.subr.msk.bf16.mxu1 %vm384_vm9, %v367_v29  ;;  %v1358_v24 = vld [vmem:[%s1801_s3 + $0x10] ss:$8 sps:$4 sm:$0xff]  }
  0x92   : > { %v484_v32 = vpop.permute.xlu1 %483  ;;  %455 = vmatpush1.bf16.msra.mxu1 %v435_v30  ;;  %v482_v33 = vpop.permute.xlu0 %481 }
  0x93   : > { %v486_v35 = vsel %vm485_vm11, %v482_v33, %v484_v32  ;;  %v490_v36 = vsel %vm485_vm11, 0, %v482_v33 }
  0x94   : > { %v508_v37 = vsel %vm506_vm12, %v490_v36, 0  ;;  %v509_v38 = vsel %vm507_vm13, %v486_v35, 0  ;;  %1256 = vmatmul.mubr.msk.bf16.vlgmr.msra.gmra.mxu0 %vm380_vm14, %v1254_v31 }
  0x95   : > { %1258 = vmatmul.mubr.msk.bf16.vlgmr.msra.gmra.mxu1 %vm380_vm14, %v368_v34  ;;  %1260 = vmatprep.subr.msk.bf16.mxu0 %vm384_vm9, %v509_v38  ;;  %v516_v39 = vsel %vm384_vm9, %v508_v37, 0 }
  0x96   : > { %v567_v40 = vpop.permute.xlu1 %566  ;;  %536 = vmatpush1.bf16.msra.mxu0 %v516_v39  ;;  %v565_v41 = vpop.permute.xlu0 %564  ;;  %553 = vmatprep.mubr.bf16.mxu0 %v1430_v0 }
  0x97   : > { %v569_v42 = vsel %vm568_vm15, %v565_v41, %v567_v40  ;;  %v573_v43 = vsel %vm568_vm15, 0, %v565_v41  ;;  %620 = vmatprep.mubr.bf16.mxu1 %v1430_v0  ;;  %1266 = vmatprep.subr.msk.bf16.mxu0 %vm384_vm9, %v1550_v2 }
  0x98   : > { %v575_v44 = vsel %vm364_vm8, %v573_v43, 0  ;;  %v576_v45 = vsel %vm365_vm10, %v569_v42, 0 }
  0x99   : > { %1263 = vmatprep.subr.msk.bf16.mxu1 %vm384_vm9, %v576_v45  ;;  %v583_v46 = vsel %vm384_vm9, %v575_v44, 0 }
  0x9a   : > { %603 = vmatpush1.bf16.msra.mxu1 %v583_v46  ;;  %v688_v49 = vpop.permute.xlu1 %687  ;;  %v686_v50 = vpop.permute.xlu0 %685 }
  0x9b   : > { %v694_v52 = vsel %vm689_vm0, %v688_v49, 0  ;;  %v690_v53 = vsel %vm689_vm0, %v686_v50, %v688_v49 }
  0x9c   : > { %1261 = vmatmul.mubr.msk.bf16.vlgmr.msra.gmra.mxu0 %vm380_vm14, %v1259_v47  ;;  %v697_v54 = vsel %vm507_vm13, %v694_v52, 0  ;;  %v696_v55 = vsel %vm506_vm12, %v690_v53, 0 }
  0x9d   : > { %1264 = vmatmul.mubr.msk.bf16.vlgmr.msra.gmra.mxu1 %vm380_vm14, %v1262_v48  ;;  %657 = vmatpush1.bf16.msra.mxu0 %v637_v51  ;;  %v704_v56 = vsel %vm384_vm9, %v696_v55, 0 }
  0x9e   : > { %1269 = vmatprep.subr.msk.bf16.mxu1 %vm384_vm9, %v697_v54  ;;  %v755_v57 = vpop.permute.xlu1 %754  ;;  %v753_v58 = vpop.permute.xlu0 %752  ;;  %674 = vmatprep.mubr.bf16.mxu0 %v1430_v0 }
  0x9f   : > { %v761_v59 = vsel %vm756_vm1, %v755_v57, 0  ;;  %724 = vmatpush1.bf16.msra.mxu1 %v704_v56  ;;  %v757_v60 = vsel %vm756_vm1, %v753_v58, %v755_v57  ;;  %741 = vmatprep.mubr.bf16.mxu1 %v1430_v0 }
  0xa0   : > { %v764_v61 = vsel %vm365_vm10, %v761_v59, 0  ;;  %v763_v62 = vsel %vm364_vm8, %v757_v60, 0 }
  0xa1   : > { %1272 = vmatprep.subr.msk.bf16.mxu0 %vm384_vm9, %v764_v61  ;;  %v771_v5 = vsel %vm384_vm9, %v763_v62, 0 }
  0xa2   : > { %v822_v2 = vpop.permute.xlu1 %821  ;;  %v820_v4 = vpop.permute.xlu0 %819 }
  0xa3   : > { %v827_v6 = vsel %vm823_vm2, %v822_v2, 0  ;;  %v824_v7 = vsel %vm823_vm2, %v820_v4, %v822_v2 }
  0xa4   : > { %1267 = vmatmul.mubr.msk.bf16.vlgmr.msra.gmra.mxu0 %vm380_vm14, %v1265_v63  ;;  %v834_v9 = vsel %vm384_vm9, %v824_v7, 0  ;;  %1275 = vmatprep.subr.msk.bf16.mxu1 %vm384_vm9, %v827_v6 }
  0xa5   : > { %1270 = vmatmul.mubr.msk.bf16.vlgmr.msra.gmra.mxu1 %vm380_vm14, %v1268_v1  ;;  %791 = vmatpush1.bf16.msra.mxu0 %v771_v5 }
  0xa6   : > { %853 = vmatpush1.bf16.msra.mxu1 %v834_v9  ;;  %808 = vmatprep.mubr.bf16.mxu0 %v1430_v0  ;;  %v884_v10 = vpop.permute.xlu1 %883  ;;  %v882_v11 = vpop.permute.xlu0 %881 }
  0xa7   : > { %870 = vmatprep.mubr.bf16.mxu1 %v1430_v0  ;;  %1025 = vmatprep.subr.bf16.mxu1 %v1354_v8  ;;  %v890_v12 = vsel %vm885_vm3, %v884_v10, 0  ;;  %v886_v13 = vsel %vm885_vm3, %v882_v11, %v884_v10 }
  0xa8   : > { %v893_v14 = vsel %vm507_vm13, %v890_v12, 0  ;;  %v892_v15 = vsel %vm506_vm12, %v886_v13, 0 }
  0xa9   : > { %1278 = vmatprep.subr.msk.bf16.mxu0 %vm384_vm9, %v893_v14  ;;  %v900_v19 = vsel %vm384_vm9, %v892_v15, 0 }
  0xac   : > { %1273 = vmatmul.mubr.msk.bf16.vlgmr.msra.gmra.mxu0 %vm380_vm14, %v1271_v16 }
  0xad   : > { %1276 = vmatmul.mubr.msk.bf16.vlgmr.msra.gmra.mxu1 %vm380_vm14, %v1274_v18  ;;  %920 = vmatpush1.bf16.msra.mxu0 %v900_v19 }
  0xae   : > { %1026 = vmatpush1.bf16.msra.mxu1 %v1352_v17  ;;  %937 = vmatprep.mubr.bf16.mxu0 %v1430_v0 }
  0xaf   : > { %1027 = vmatprep.subr.bf16.mxu1 %v1357_v20  ;;  %1049 = vmatprep.mubr.bf16.mxu1 %v1430_v0  ;;  %v1361_v0 = vld [vmem:[%s1801_s3] ss:$8 sps:$4 sm:$0xff]  }
  0xb2   : > { %1028 = vmatpush1.bf16.msra.mxu1 %v1355_v21 }
  0xb3   : > { %1029 = vmatprep.subr.bf16.mxu1 %v1360_v22  ;;  %v952_v11 = vpop.permute.xlu0 %951  ;;  %v958_v15 = vpop.permute.xlu1 %957 }
  0xb4   : > { %1279 = vmatmul.mubr.msk.bf16.vlgmr.msra.gmra.mxu0 %vm380_vm14, %v1277_v23 }
  0xb6   : > { %1030 = vmatpush1.bf16.msra.mxu1 %v1358_v24 }
  0xb7   : > { %1031 = vmatprep.subr.bf16.mxu1 %v1363_v25 }
  0xba   : > { %1032 = vmatpush1.bf16.msra.mxu1 %v1361_v0 }
  0xbd   : > { %1288 = vmatmul.mubr.msk.bf16.vlgmr.msra.gmra.mxu1 %vm1013_vm4, %v964_v26 }
 0x154   : > { %v424_v27 = vpop.f32.mrf.mxu0 }
 0x155   : > { %v474_v28 = vpop.f32.mrf.mxu1 }
 0x156   : > { %v426_v29 = vpop.f32.mrf.mxu0  ;;  %v475_v40 = vadd.f32 %v474_v28, %v424_v27 }
 0x157   : > { %v476_v30 = vpop.f32.mrf.mxu1 }
 0x158   : > { %v428_v31 = vpop.f32.mrf.mxu0  ;;  %v477_v43 = vadd.f32 %v476_v30, %v426_v29 }
 0x159   : > { %v478_v32 = vpop.f32.mrf.mxu1 }
 0x15a   : > { %v429_v33 = vpop.f32.mrf.mxu0 }
 0x15b   : > { %v479_v34 = vpop.f32.mrf.mxu1 }
 0x15c   : > { %v555_v35 = vpop.f32.mrf.mxu0 }
 0x15d   : > { %v622_v36 = vpop.f32.mrf.mxu1  ;;  %v562_v44 = vadd.f32 %v555_v35, %v475_v40 }
 0x15e   : > { %v557_v37 = vpop.f32.mrf.mxu0 }
 0x15f   : > { %v624_v38 = vpop.f32.mrf.mxu1  ;;  %v563_v47 = vadd.f32 %v557_v37, %v477_v43  ;;  %v629_v50 = vadd.f32 %v622_v36, %v562_v44  ;;  %v1075_v44 = vld [vmem:[%s1803_s5 + $0x10] sm:$0xff] }
 0x160   : > { %v559_v39 = vpop.f32.mrf.mxu0 }
 0x161   : > { %v626_v41 = vpop.f32.mrf.mxu1  ;;  %v630_v53 = vadd.f32 %v624_v38, %v563_v47  ;;  %v1073_v38 = vld [vmem:[%s1803_s5] sm:$0xff]  ;;  %v1074_v39 = vld [vmem:[%s1803_s5 + $0x8] sm:$0xff] }
 0x162   : > { %v560_v42 = vpop.f32.mrf.mxu0 }
 0x163   : > { %v627_v45 = vpop.f32.mrf.mxu1 }
 0x164   : > { %v676_v46 = vpop.f32.mrf.mxu0  ;;  %v1076_v45 = vld [vmem:[%s1803_s5 + $0x18] sm:$0xff] }
 0x165   : > { %v743_v48 = vpop.f32.mrf.mxu1  ;;  %v683_v54 = vadd.f32 %v676_v46, %v629_v50 }
 0x166   : > { %v678_v49 = vpop.f32.mrf.mxu0 }
 0x167   : > { %v745_v51 = vpop.f32.mrf.mxu1  ;;  %v684_v57 = vadd.f32 %v678_v49, %v630_v53  ;;  %v750_v60 = vadd.f32 %v743_v48, %v683_v54  ;;  %v1077_v53 = vld [vmem:[%s1803_s5 + $0x20] sm:$0x1] }
 0x168   : > { %v680_v52 = vpop.f32.mrf.mxu0 }
 0x169   : > { %v747_v55 = vpop.f32.mrf.mxu1  ;;  %v751_v63 = vadd.f32 %v745_v51, %v684_v57 }
 0x16a   : > { %v681_v56 = vpop.f32.mrf.mxu0 }
 0x16b   : > { %v748_v58 = vpop.f32.mrf.mxu1  ;;  %v1116_v56 = vsel %vm1115_vm5, %v1077_v53, 0.0 }
 0x16c   : > { %v810_v59 = vpop.f32.mrf.mxu0 }
 0x16d   : > { %v872_v61 = vpop.f32.mrf.mxu1  ;;  %v817_v1 = vadd.f32 %v810_v59, %v750_v60 }
 0x16e   : > { %v812_v62 = vpop.f32.mrf.mxu0 }
 0x16f   : > { %v874_v2 = vpop.f32.mrf.mxu1  ;;  %v818_v5 = vadd.f32 %v812_v62, %v751_v63  ;;  %v879_v8 = vadd.f32 %v872_v61, %v817_v1 }
 0x170   : > { %v814_v4 = vpop.f32.mrf.mxu0 }
 0x171   : > { %v876_v6 = vpop.f32.mrf.mxu1  ;;  %v880_v12 = vadd.f32 %v874_v2, %v818_v5  ;;  %v1125_v4 = vld [vmem:[%s1804_s6] sm:$0xff] }
 0x172   : > { %v815_v7 = vpop.f32.mrf.mxu0 }
 0x173   : > { %v877_v9 = vpop.f32.mrf.mxu1 }
 0x174   : > { %v939_v10 = vpop.f32.mrf.mxu0 }
 0x175   : > { %v946_v13 = vadd.f32 %v939_v10, %v879_v8  ;;  %v1441_v8 = vmov 2  }
 0x176   : > { %v941_v14 = vpop.f32.mrf.mxu0 }
 0x177   : > { %v947_v16 = vadd.f32 %v941_v14, %v880_v12  ;;  %v954_v17 = vmul.f32 %v952_v11, %v946_v13 }
 0x178   : > { %v943_v18 = vpop.f32.mrf.mxu0 }
 0x179   : > { %v955_v19 = vmul.f32 %v952_v11, %v947_v16  ;;  %v960_v20 = vadd.f32 %v958_v15, %v954_v17 }
 0x17a   : > { %v944_v21 = vpop.f32.mrf.mxu0 }
 0x17b   : > { %v961_v22 = vadd.f32 %v958_v15, %v955_v19  ;;  %v1709_v23 = vmax.f32 %v960_v20, 0.0 }
 0x17d   : > { %v1711_v24 = vmax.f32 %v961_v22, 0.0  ;;  %v1713_v25 = vpop.f32.mrf.mxu1 }
 0x17e   : > { %v1146_v20 = vsub.f32 %v1709_v23, %v1713_v25 }
 0x17f   : > { %v1715_v0 = vpop.f32.mrf.mxu1  ;;  %v1058_v26 = vadd.f32 %v1711_v24, %v1709_v23  ;;  %v1067_v31 = vmax.f32 %v1709_v23, %v1711_v24 }
 0x180   : > { %v1063_v27 = vadd.f32 %v1715_v0, %v1713_v25  ;;  %v1070_v30 = vmax.f32 %v1713_v25, %v1715_v0 }
 0x181   : > { %v1055_v28 = vpop.f32.mrf.mxu1  ;;  %1059 = vadd.xlane.f32.xlu1 %v1058_v26 }
 0x182   : > { %1064 = vadd.xlane.f32.xlu0 %v1063_v27 }
 0x183   : > { %v1056_v29 = vpop.f32.mrf.mxu1 }
 0x185   : > { %1071 = vmax.xlane.f32.xlu1 %v1070_v30 }
 0x186   : > { %1068 = vmax.xlane.f32.xlu0 %v1067_v31 }
 0x20a   : > { %v1060_v32 = vpop.xlane.xlu1 %1059 }
 0x20b   : > { %v1062_v33 = vmul.f32 0.00390625, %v1060_v32  ;;  %v1065_v34 = vpop.xlane.xlu0 %1064 }
 0x20c   : > { %v1066_v35 = vmul.f32 0.00390625, %v1065_v34 }
 0x20d   : > { %1080 = vperm.xlu0 %1348, %v1062_v33  }
 0x20e   : > { %1085 = vperm.xlu1 %1350, %v1066_v35   ;;  %v1072_v36 = vpop.xlane.xlu1 %1071 }
 0x20f   : > { %v1069_v37 = vpop.xlane.xlu0 %1068 }
 0x211   : > { %1095 = vperm.xlu0 %1348, %v1072_v36  }
 0x212   : > { %1090 = vperm.xlu1 %1350, %v1069_v37  }
 0x215   : > { %1131 = vrot.lane.b32.xlu0 %v1571_v3, %s1435_s22  ;;  %s1160_s22 = scalar_lea.sflag [#allocation3], %s282_s19 }
 0x216   : > { %1351 = vset.pattern.permute.xlu0 %v1441_v8 }
 0x219   : > { %1135 = vrot.lane.b32.xlu0 %v1571_v3, %s1440_s13  ;;  %s1249_s13 = sshll.u32 %s282_s19, 4 }
 0x21a   : > { %s284_s20 = scalar_lea.vmem [#allocation2], %s1249_s13 }
 0x21b   : > { %s1174_s21 = sshll.u32 %s284_s20, 4  ;;  %s1175_s21 = int_to_ptr.vmem [resolvable:$true] %s1174_s21 }
 0x21c   : > { %s1368_s9 = scalar_lea.vmem %s1175_s21, 256  ;;  %p1375_p0 = scmp.lt.s32.totalorder %s1175_s21, %s1373_s15 }
 0x21d   : > { %p1369_p11 = scmp.ne.s32.totalorder %s1175_s21, %s1368_s9  ;;  %p1376_p1 = scmp.lt.s32.totalorder %s1374_s16, %s1368_s9 }
 0x21f   : > { %p1370_p12 = pnand %p1369_p11, %p1521_p5  ;;  %p1377_p2 = por %p1376_p1, %p1375_p0 }
 0x221   : > { %p1371_p13 = pneg %p1370_p12 }
 0x223   : > { %p1378_p3 = pnand %p1377_p2, %p1371_p13 }
 0x288   : > { %v1081_v40 = vpop.permute.xlu0 %1080 }
 0x289   : > { %v1086_v41 = vpop.permute.xlu1 %1085  ;;  %v1103_v42 = vmul.f32 %v1081_v40, %v1073_v38 }
 0x28a   : > { %v1104_v43 = vmul.f32 %v1086_v41, %v1074_v39 }
 0x28b   : > { %v1108_v47 = vsel %vm380_vm14, %v1103_v42, 0.0 }
 0x28c   : > { %v1109_v46 = vsel %vm380_vm14, %v1104_v43, 0.0  ;;  %v1096_v48 = vpop.permute.xlu0 %1095 }
 0x28d   : > { %v1091_v49 = vpop.permute.xlu1 %1090  ;;  %v1106_v51 = vmul.f32 %v1096_v48, %v1076_v45  ;;  %v1110_v52 = vadd.f32 %v1109_v46, %v1108_v47 }
 0x28e   : > { %v1105_v50 = vmul.f32 %v1091_v49, %v1075_v44 }
 0x28f   : > { %v1113_v57 = vsel %vm380_vm14, %v1106_v51, 0.0 }
 0x290   : > { %v1111_v54 = vsel %vm380_vm14, %v1105_v50, 0.0  ;;  %v1132_v9 = vpop.permute.xlu0 %1131 }
 0x291   : > { %v1112_v55 = vadd.f32 %v1111_v54, %v1110_v52 }
 0x293   : > { %v1114_v58 = vadd.f32 %v1113_v57, %v1112_v55 }
 0x294   : > { %v1136_v12 = vpop.permute.xlu0 %1135 }
 0x295   : > { %v1117_v59 = vadd.f32 %v1116_v56, %v1114_v58 }
 0x297   : > { %v1118_v60 = vrot.slane %v1117_v59, 4 }
 0x299   : > { %v1119_v61 = vadd.f32 %v1118_v60, %v1117_v59 }
 0x29b   : > { %v1120_v62 = vrot.slane %v1119_v61, 2 }
 0x29d   : > { %v1121_v63 = vadd.f32 %v1120_v62, %v1119_v61 }
 0x29f   : > { %v1122_v1 = vrot.slane %v1121_v63, 1 }
 0x2a1   : > { %v1123_v2 = vadd.f32 %v1122_v1, %v1121_v63 }
 0x2a3   : > { %v1124_v5 = vmax.f32 %v1123_v2, 0.0 }
 0x2a5   : > { %v1126_v6 = vmul.f32 %v1125_v4, %v1124_v5 }
 0x2a7   : > { %v1127_v7 = vsel %vm380_vm14, %v1126_v6, 0.0 }
 0x2a8   : > { %1128 = vadd.xlane.f32.xlu1 %v1127_v7 }
 0x331   : > { %v1129_v10 = vpop.xlane.xlu1 %1128 }
 0x332   : > { %v1130_v11 = vadd.f32 %v1129_v10, %v1571_v3  ;;  %v1147_v3 = vsub.f32 %v1711_v24, %v1715_v0 }
 0x334   : > { %v1134_v13 = vmul.f32 %v1132_v9, %v1130_v11 }
 0x336   : > { %v1138_v14 = vadd.f32 %v1136_v12, %v1134_v13 }
 0x338   : > { %v1289_v15 = vmul.f32 -1.442695, %v1138_v14 }
 0x33a   : > { %1364 = vpow2.f32 %v1289_v15 }
 0x347   : > { %v1365_v16 = vpop.eup %1364 }
 0x348   : > { %v1142_v17 = vadd.f32 1.0, %v1365_v16 }
 0x34a   : > { %1366 = vrcp.f32 %v1142_v17 }
 0x357   : > { %v1367_v18 = vpop.eup %1366 }
 0x358   : > { %v1145_v19 = vmul.f32 %v1367_v18, %v1130_v11 }
 0x35a   : > { %1150 = vperm.xlu0 %1351, %v1145_v19  }
 0x3d5   : > { %v1151_v21 = vpop.permute.xlu0 %1150 }
 0x3d6   : > { %v1153_v22 = vmul.f32 %v1151_v21, %v1146_v20  ;;  %v1154_v26 = vmul.f32 %v1151_v21, %v1147_v3 }
 0x3d8   : > { %v1155_v27 = vadd.f32 %v1153_v22, %v1713_v25  ;;  %v1156_v28 = vadd.f32 %v1154_v26, %v1715_v0 }
 0x3da   : > { %1157 = vst [vmem:[%s284_s20] sm:$0xff] %v1155_v27  ;;  %1158 = vst [vmem:[%s284_s20 + $0x8] sm:$0xff] %v1156_v28 }
 0x3db   : > { %1381 = shalt.err (!%p1378_p3)
}
 0x3dc   : > { %s1382_s17 = scalar_lea.hbm %s1763_s8, 256  ;;  %s1386_s13 = scalar_lea.hbm %s1805_s7, 512 }
 0x3dd   : > { %p1383_p4 = scmp.ne.s32.totalorder %s1763_s8, %s1382_s17  ;;  %p1387_p9 = scmp.lt.s32.totalorder %s1763_s8, %s1805_s7 }
 0x3de   : > { %p1388_p10 = scmp.lt.s32.totalorder %s1386_s13, %s1382_s17 }
 0x3df   : > { %p1384_p7 = pnand %p1383_p4, %p1521_p5 }
 0x3e0   : > { %p1389_p11 = por %p1388_p10, %p1387_p9 }
 0x3e1   : > { %p1385_p8 = pneg %p1384_p7 }
 0x3e3   : > { %p1390_p12 = pnand %p1389_p11, %p1385_p8 }
 0x3e5   : > { %1393 = shalt.err (!%p1390_p12)
}
 0x3e6   : > { %1297 = dma.vmem_to_hbm [thread:$0]  (%p1521_p5), %s1175_s21, 256, %s1763_s8, %s1160_s22  }
 0x3e7 PF: > { %p1303_p13 = scmp.ge.s32.totalorder %s1428_s27, 2  ;;  %s1186_s23 = sand.u32 1, %s1416_s24  }
 0x3e8   : > { %s1187_s29 = scalar_lea.sflag [#allocation3], %s1186_s23 }
 0x3e9   : > { %p1300_p0 = pnand %p1303_p13, %p1525_p6 }
 0x3eb   : > { %p1301_p1 = pneg %p1300_p0 }
 0x3ed   : > { %1411 = dma.done.wait (%p1301_p1), %s1187_s29, 256  }
 0x3ee   : > { %1413 = vsyncadd (%p1301_p1), %s1187_s29, 4294967040  ;;  %p17_p2 = scmp.ge.s32.totalorder %s1508_s30, 4   ;;  %s1808_s24 = smov %s1420_s25 }
 0x3ef   : > { %s1809_s25 = smov %s1424_s26  ;;  %s1810_s26 = smov %s1519_s10 }
 0x3f0   : > { %s1811_s27 = smov %s1508_s30  ;;  %19 = sbr.rel (!%p17_p2) target bundleno = 3 (0x3), region = 94 }
 0x3f5   :  { %1192 = vsyncpa [#allocation3], 1 }
 0x3f6   :  { %1194 = vsyncpa [#allocation3 + $0x1], 1 }

</bundles_post_ra>
